<compile_context>
chip_gen: v7x
topology: tpu7x:2x2x1
jax: 0.10.0
libtpu: 0.0.40
codegen_flags: <defaults>
</compile_context>

<pallas_src>
import functools

import jax
import jax.numpy as jnp
from jax.experimental import pallas as pl
from jax.experimental.pallas import tpu as pltpu

# ---------------- constants (deterministic "parameters") ----------------
CIFAR10_MEAN = (0.4914, 0.4822, 0.4465)
CIFAR10_STD = (0.2470, 0.2435, 0.2616)

N_OPS = 2          # RandAugment num_ops
MAGNITUDE = 9      # RandAugment magnitude
_NUM_BINS = 31
_MAG_VALUE = 0.9 * MAGNITUDE / (_NUM_BINS - 1)      # 0.27
BRIGHT_FACTOR = 1.0 + _MAG_VALUE                    # op 1 of 2
CONTRAST_FACTOR = 1.0 + _MAG_VALUE                  # op 2 of 2

# torchvision rgb_to_grayscale weights (used by adjust_contrast)
_GRAY_R, _GRAY_G, _GRAY_B = 0.2989, 0.587, 0.114


# ---------------- Pallas kernel ----------------
def _randaug_kernel(x_ref, o_ref, *, hw, scale, bias):
    # x_ref: (TB, C*HW) uint8; o_ref: (TB, C*HW) float32 (or bf16)
    x = x_ref[...].astype(jnp.float32)

    # --- RandAugment op 1: Brightness.  x >= 0 and factor > 0, so only the
    # upper bound of clip(x*f, 0, 255) can trigger (exact simplification).
    xb = jnp.minimum(x * BRIGHT_FACTOR, 255.0)

    # Channel views: channels live in the lane dim as contiguous HW-wide
    # slices (HW is a multiple of 128 -> aligned, unmasked lane slices).
    r = xb[:, 0 * hw:1 * hw]
    g = xb[:, 1 * hw:2 * hw]
    b = xb[:, 2 * hw:3 * hw]

    # --- RandAugment op 2: Contrast reference = per-image grayscale mean.
    gray = _GRAY_R * r + _GRAY_G * g + _GRAY_B * b       # (TB, HW)
    gm = jnp.mean(gray, axis=-1, keepdims=True)          # (TB, 1) per image

    # Contrast blend + clamp + ToTensor(/255) + Normalize folded per channel
    # into one multiply-add + clip in the normalized domain (s_c > 0):
    #   clip(C*xb + (1-C)*gm, 0, 255) * s_c + b_c
    # = clip((C*s_c)*xb + ((1-C)*s_c*gm + b_c), b_c, 255*s_c + b_c)
    for c, (xc, s_c, b_c) in enumerate(zip((r, g, b), scale, bias)):
        off = ((1.0 - CONTRAST_FACTOR) * s_c) * gm + b_c   # (TB, 1), per image
        y = xc * (CONTRAST_FACTOR * s_c) + off
        y = jnp.clip(y, b_c, 255.0 * s_c + b_c)
        o_ref[:, c * hw:(c + 1) * hw] = y.astype(o_ref.dtype)


# ---------------- wrapper ----------------
def _vmem_config():
    """Pick (block budget bytes, vmem_limit_bytes) from the part's VMEM size."""
    vmem_cap = 64 * 1024 * 1024          # conservative default (v7x-sized)
    try:
        vmem_cap = int(pltpu.get_tpu_info().vmem_capacity_bytes)
    except Exception:
        pass
    if vmem_cap >= 96 * 1024 * 1024:     # v5e / v6e: 128 MiB VMEM
        return 24 * 1024 * 1024, 80 * 1024 * 1024
    return 8 * 1024 * 1024, 32 * 1024 * 1024


def _pick_tb(B, lanes, budget):
    """Rows (images) per block: fit the padded working set, keep pipeline fed."""
    lanes_pad = ((lanes + 127) // 128) * 128
    # uint8 input (x2 double buffer) + f32 output (x2) + ~2 f32 blocks of
    # live temporaries (post-brightness block, gray / per-channel result).
    bytes_per_row = lanes_pad * (2 * 1 + 2 * 4 + 2 * 4)
    tb = max(1, min(B, budget // bytes_per_row))
    # >= 4 grid steps on large batches: 2 TensorCores (v7x) x 2 pipeline stages.
    if B >= 32:
        tb = min(tb, pl.cdiv(B, 4))
    # Sublane-dense f32 tiles when possible.
    if tb >= 8:
        tb = (tb // 8) * 8
    return tb


def randaugment_transform(x, mean=CIFAR10_MEAN, std=CIFAR10_STD,
                          out_dtype=jnp.float32):
    """x: (B, 3, H, W) uint8 images in [0, 255]. Returns (B, 3, H, W) float."""
    if x.dtype != jnp.uint8:
        x = jnp.clip(x, 0, 255).astype(jnp.uint8)
    B, C, H, W = x.shape
    assert C == 3, "RandAugment contrast op assumes RGB input"
    HW = H * W
    L = C * HW

    # Fused ToTensor+Normalize constants (per channel, compile-time scalars).
    scale = tuple(1.0 / (255.0 * float(s)) for s in std)
    bias = tuple(-float(m) / float(s) for m, s in zip(mean, std))

    # Lane-dense layout: channels folded into the lane dim -> (B, C*HW);
    # batch sits on the sublane axis (no (3, *) sublane-padding waste).
    x2 = x.reshape(B, L)

    budget, vmem_limit = _vmem_config()
    tb = _pick_tb(B, L, budget)

    kernel = functools.partial(_randaug_kernel, hw=HW, scale=scale, bias=bias)

    # out_dtype=jnp.bfloat16 cuts HBM write traffic ~2x if the consumer
    # accepts it; float32 kept by default to match Normalize semantics.
    out = pl.pallas_call(
        kernel,
        out_shape=jax.ShapeDtypeStruct((B, L), out_dtype),
        grid=(pl.cdiv(B, tb),),          # masked tail block; no divisibility req.
        in_specs=[pl.BlockSpec((tb, L), lambda i: (i, 0))],
        out_specs=pl.BlockSpec((tb, L), lambda i: (i, 0)),
        compiler_params=pltpu.CompilerParams(
            dimension_semantics=("parallel",),
            vmem_limit_bytes=vmem_limit,
        ),
    )(x2)
    return out.reshape(B, C, H, W)


# ---------------- pure-JAX reference (same deterministic semantics) ----------------
def _reference(x, mean=CIFAR10_MEAN, std=CIFAR10_STD):
    x = x.astype(jnp.float32)
    x = jnp.clip(x * BRIGHT_FACTOR, 0.0, 255.0)
    gray = (_GRAY_R * x[:, 0:1] + _GRAY_G * x[:, 1:2] + _GRAY_B * x[:, 2:3])
    gm = jnp.mean(gray, axis=(1, 2, 3), keepdims=True)
    x = jnp.clip(CONTRAST_FACTOR * x + (1.0 - CONTRAST_FACTOR) * gm, 0.0, 255.0)
    x = x / 255.0
    mean_a = jnp.asarray(mean, jnp.float32).reshape(1, -1, 1, 1)
    std_a = jnp.asarray(std, jnp.float32).reshape(1, -1, 1, 1)
    return (x - mean_a) / std_a


if __name__ == "__main__":
    key = jax.random.PRNGKey(0)
    # B=10 is deliberately not a multiple of the 8-row block -> exercises the
    # masked tail block path of grid=cdiv(B, tb).
    B, C, H, W = 10, 3, 16, 16
    x = jax.random.randint(key, (B, C, H, W), 0, 256, dtype=jnp.int32).astype(jnp.uint8)

    out = jax.block_until_ready(randaugment_transform(x))
    ref = _reference(x)

    assert out.shape == (B, C, H, W) and out.dtype == jnp.float32
    assert jnp.allclose(out, ref, atol=1e-4, rtol=1e-4), "mismatch vs reference"
    print("KERNEL_OK")
</pallas_src>

<mosaic_0001>
module attributes {stable_mosaic.version = 11 : i64} {
  func.func @_randaug_kernel(%arg0: i32, %arg1: memref<8x768xi8, #tpu.memory_space<vmem>>, %arg2: memref<8x768xf32, #tpu.memory_space<vmem>>) attributes {dimension_semantics = [#tpu.dimension_semantics<parallel>], iteration_bounds = array<i64: 2>, scalar_prefetch = 0 : i64, scratch_operands = 0 : i64, tpu.core_type = #tpu.core_type<tc>, window_params = [{transform_indices = @transform_0, window_bounds = array<i64: 8, 768>}, {transform_indices = @transform_1, window_bounds = array<i64: 8, 768>}]} {
    %c0 = arith.constant 0 : index
    %c0_0 = arith.constant 0 : index
    %0 = vector.load %arg1[%c0, %c0_0] : memref<8x768xi8, #tpu.memory_space<vmem>>, vector<8x768xi8>
    %1 = arith.uitofp %0 : vector<8x768xi8> to vector<8x768xf32>
    %cst = arith.constant 1.270000e+00 : f32
    %2 = vector.broadcast %cst : f32 to vector<8x768xf32>
    %3 = arith.mulf %1, %2 : vector<8x768xf32>
    %cst_1 = arith.constant 2.550000e+02 : f32
    %4 = vector.broadcast %cst_1 : f32 to vector<8x768xf32>
    %5 = arith.minimumf %3, %4 : vector<8x768xf32>
    %6 = vector.extract_strided_slice %5 {offsets = [0, 0], sizes = [8, 256], strides = [1, 1]} : vector<8x768xf32> to vector<8x256xf32>
    %7 = vector.extract_strided_slice %5 {offsets = [0, 256], sizes = [8, 256], strides = [1, 1]} : vector<8x768xf32> to vector<8x256xf32>
    %8 = vector.extract_strided_slice %5 {offsets = [0, 512], sizes = [8, 256], strides = [1, 1]} : vector<8x768xf32> to vector<8x256xf32>
    %cst_2 = arith.constant 2.989000e-01 : f32
    %9 = vector.broadcast %cst_2 : f32 to vector<8x256xf32>
    %10 = arith.mulf %9, %6 : vector<8x256xf32>
    %cst_3 = arith.constant 5.870000e-01 : f32
    %11 = vector.broadcast %cst_3 : f32 to vector<8x256xf32>
    %12 = arith.mulf %11, %7 : vector<8x256xf32>
    %13 = arith.addf %10, %12 : vector<8x256xf32>
    %cst_4 = arith.constant 1.140000e-01 : f32
    %14 = vector.broadcast %cst_4 : f32 to vector<8x256xf32>
    %15 = arith.mulf %14, %8 : vector<8x256xf32>
    %16 = arith.addf %13, %15 : vector<8x256xf32>
    %cst_5 = arith.constant dense<0.000000e+00> : vector<8xf32>
    %17 = vector.multi_reduction <add>, %16, %cst_5 [1] : vector<8x256xf32> to vector<8xf32>
    %18 = vector.shape_cast %17 : vector<8xf32> to vector<8x1xf32>
    %cst_6 = arith.constant 2.560000e+02 : f32
    %19 = vector.broadcast %cst_6 : f32 to vector<8x1xf32>
    %20 = arith.divf %18, %19 : vector<8x1xf32>
    %cst_7 = arith.constant -0.00428673485 : f32
    %21 = vector.broadcast %cst_7 : f32 to vector<8x1xf32>
    %22 = arith.mulf %21, %20 : vector<8x1xf32>
    %cst_8 = arith.constant -1.9894737 : f32
    %23 = vector.broadcast %cst_8 : f32 to vector<8x1xf32>
    %24 = arith.addf %22, %23 : vector<8x1xf32>
    %cst_9 = arith.constant 0.0201635305 : f32
    %25 = vector.broadcast %cst_9 : f32 to vector<8x256xf32>
    %26 = arith.mulf %6, %25 : vector<8x256xf32>
    %27 = vector.broadcast %24 : vector<8x1xf32> to vector<8x256xf32>
    %28 = arith.addf %26, %27 : vector<8x256xf32>
    %cst_10 = arith.constant -1.9894737 : f32
    %cst_11 = arith.constant 2.05910921 : f32
    %29 = vector.broadcast %cst_10 : f32 to vector<8x256xf32>
    %30 = arith.maximumf %29, %28 : vector<8x256xf32>
    %31 = vector.broadcast %cst_11 : f32 to vector<8x256xf32>
    %32 = arith.minimumf %31, %30 : vector<8x256xf32>
    %c0_12 = arith.constant 0 : index
    %c0_13 = arith.constant 0 : index
    %33 = vector.load %arg2[%c0_12, %c0_13] : memref<8x768xf32, #tpu.memory_space<vmem>>, vector<8x256xf32>
    tpu.vector_store %arg2[%c0_12, %c0_13], %32 {strides = array<i32>} : memref<8x768xf32, #tpu.memory_space<vmem>>, vector<8x256xf32>,
    %cst_14 = arith.constant -0.00434835115 : f32
    %34 = vector.broadcast %cst_14 : f32 to vector<8x1xf32>
    %35 = arith.mulf %34, %20 : vector<8x1xf32>
    %cst_15 = arith.constant -1.98028743 : f32
    %36 = vector.broadcast %cst_15 : f32 to vector<8x1xf32>
    %37 = arith.addf %35, %36 : vector<8x1xf32>
    %cst_16 = arith.constant 0.0204533562 : f32
    %38 = vector.broadcast %cst_16 : f32 to vector<8x256xf32>
    %39 = arith.mulf %7, %38 : vector<8x256xf32>
    %40 = vector.broadcast %37 : vector<8x1xf32> to vector<8x256xf32>
    %41 = arith.addf %39, %40 : vector<8x256xf32>
    %cst_17 = arith.constant -1.98028743 : f32
    %cst_18 = arith.constant 2.12648869 : f32
    %42 = vector.broadcast %cst_17 : f32 to vector<8x256xf32>
    %43 = arith.maximumf %42, %41 : vector<8x256xf32>
    %44 = vector.broadcast %cst_18 : f32 to vector<8x256xf32>
    %45 = arith.minimumf %44, %43 : vector<8x256xf32>
    %c0_19 = arith.constant 0 : index
    %c256 = arith.constant 256 : index
    %46 = vector.load %arg2[%c0_19, %c256] : memref<8x768xf32, #tpu.memory_space<vmem>>, vector<8x256xf32>
    tpu.vector_store %arg2[%c0_19, %c256], %45 {strides = array<i32>} : memref<8x768xf32, #tpu.memory_space<vmem>>, vector<8x256xf32>,
    %cst_20 = arith.constant -0.00404749066 : f32
    %47 = vector.broadcast %cst_20 : f32 to vector<8x1xf32>
    %48 = arith.mulf %47, %20 : vector<8x1xf32>
    %cst_21 = arith.constant -1.70680428 : f32
    %49 = vector.broadcast %cst_21 : f32 to vector<8x1xf32>
    %50 = arith.addf %48, %49 : vector<8x1xf32>
    %cst_22 = arith.constant 0.0190381967 : f32
    %51 = vector.broadcast %cst_22 : f32 to vector<8x256xf32>
    %52 = arith.mulf %8, %51 : vector<8x256xf32>
    %53 = vector.broadcast %50 : vector<8x1xf32> to vector<8x256xf32>
    %54 = arith.addf %52, %53 : vector<8x256xf32>
    %cst_23 = arith.constant -1.70680428 : f32
    %cst_24 = arith.constant 2.11582565 : f32
    %55 = vector.broadcast %cst_23 : f32 to vector<8x256xf32>
    %56 = arith.maximumf %55, %54 : vector<8x256xf32>
    %57 = vector.broadcast %cst_24 : f32 to vector<8x256xf32>
    %58 = arith.minimumf %57, %56 : vector<8x256xf32>
    %c0_25 = arith.constant 0 : index
    %c512 = arith.constant 512 : index
    %59 = vector.load %arg2[%c0_25, %c512] : memref<8x768xf32, #tpu.memory_space<vmem>>, vector<8x256xf32>
    tpu.vector_store %arg2[%c0_25, %c512], %58 {strides = array<i32>} : memref<8x768xf32, #tpu.memory_space<vmem>>, vector<8x256xf32>,
    return
  }
  func.func @transform_0(%arg0: i32) -> (i32, i32) {
    %c0_i32 = arith.constant 0 : i32
    %c0_i32_0 = arith.constant 0 : i32
    return %arg0, %c0_i32 : i32, i32
  }
  func.func @transform_1(%arg0: i32) -> (i32, i32) {
    %c0_i32 = arith.constant 0 : i32
    %c0_i32_0 = arith.constant 0 : i32
    return %arg0, %c0_i32 : i32, i32
  }
}

</mosaic_0001>

<bundles_post_ra>
// kernel: tpu_custom_call.1
= control target key start
LH: loop header
LB: loop body
LE: loop exit
PB: predicated region body
PF: predicated region fallthrough
CT: control target
= control target key end

     0   :  { %6 = vsyncpa [#allocation3], 0  ;;  %s626_s0 = inlined_call_operand.hbm [shape: u8[10,768], index: 0, kind: input, shape index: {}]   ;;  %s627_s1 = inlined_call_operand.hbm [shape: f32[10,768], index: 1, kind: output, shape index: {}]  }
   0x1   :  { %8 = vsyncpa [#allocation3 + $0x1], 0 }
   0x2   :  { %9 = vsyncpa [#allocation4], 0 }
   0x3   :  { %11 = vsyncpa [#allocation4 + $0x1], 0  ;;  %s470_s6 = smov 0   ;;  %s472_s7 = smov 0  }
   0x4   :  { %s474_s8 = smov 0   ;;  %s476_s9 = smov 0  }
   0x5 LB: > { %s491_s10 = sadd.s32 4294967295, %s456_s9   ;;  %s301_s11 = sadd.s32 4294967294, %s456_s9   ;;  %s456_s9 = sphi %s476_s9, %s641_s9   ;;  %s452_s8 = sphi %s474_s8, %s640_s8   ;;  %s448_s7 = sphi %s472_s7, %s639_s7   ;;  %s444_s6 = sphi %s470_s6, %s638_s6  }
   0x6   : > { %s495_s12 = sadd.s32 1, %s456_s9   ;;  %s24_s13 = sadd.s32 1, %s452_s8 }
   0x7   : > { %s21_s14 = ssub.s32 %s456_s9, %s495_s12  ;;  %p31_p0 = scmp.ne.s32.totalorder %s452_s8, %s448_s7 }
   0x8   : > { %p22_p1 = scmp.eq.s32.totalorder %s21_s14, 0  ;;  %p32_p2 = scmp.eq.s32.totalorder %s456_s9, 0 }
   0x9   : > { %p37_p3 = scmp.ne.s32.totalorder %s448_s7, %s444_s6  ;;  %p38_p4 = scmp.eq.s32.totalorder %s491_s10, 0 }
   0xa   : > { %s507_s15 = scalar_select %p22_p1, %s452_s8, %s24_s13  }
   0xb   : > { %p33_p5 = por %p32_p2, %p31_p0  ;;  %p509_p6 = por %p38_p4, %p37_p3 }
   0xc   : > { %p61_p7 = scmp.eq.s32.totalorder %s491_s10, 1  ;;  %p67_p8 = scmp.eq.s32.totalorder %s301_s11, 1 }
   0xd   : > { %p326_p10 = scmp.lt.s32.totalorder %s456_s9, 2  ;;  %s87_s19 = sand.u32 1, %s452_s8  }
   0xe   : > { %p516_p11 = por %p61_p7, %p31_p0  ;;  %p520_p12 = por %p67_p8, %p37_p3 }
   0xf   : > { %s310_s20 = smul.u32 192, %s456_s9  ;;  %p531_p13 = pnand %p326_p10, %p33_p5 }
  0x10   : > { %s630_s17 = scalar_select %p516_p11, 1, 0 }
  0x11   : > { %s631_s18 = scalar_select %p520_p12, 1, 0 }
  0x12   : > { %s309_s21 = smul.u32 12, %s87_s19  ;;  %s529_s24 = scalar_lea.hbm %s626_s0, %s310_s20 }
  0x13   : > { %s88_s28 = scalar_lea.sflag [#allocation3], %s87_s19  ;;  %s360_s29 = scalar_lea.hbm %s529_s24, 192 }
  0x14   : > { %s91_s26 = scalar_lea.vmem [#allocation2], %s309_s21  ;;  %p361_p2 = scmp.ne.s32.totalorder %s529_s24, %s360_s29 }
  0x15   : > { %s99_s27 = sshll.u32 %s91_s26, 4  ;;  %p362_p3 = pneg %p531_p13  ;;  %s536_s27 = int_to_ptr.vmem [resolvable:$true] %s99_s27 }
  0x16   : > { %s365_s3 = scalar_lea.hbm %s626_s0, 384  ;;  %p366_p7 = scmp.lt.u32.totalorder %s529_s24, %s626_s0 }
  0x17   : > { %p363_p4 = pnand %p362_p3, %p361_p2  ;;  %p367_p8 = scmp.lt.u32.totalorder %s365_s3, %s360_s29 }
  0x18   : > { %p369_p9 = scmp.lt.u32.totalorder %s360_s29, %s529_s24 }
  0x19   : > { %p364_p5 = pneg %p363_p4  ;;  %p368_p10 = por %p367_p8, %p366_p7 }
  0x1b   : > { %p370_p0 = por %p369_p9, %p368_p10 }
  0x1d   : > { %p371_p1 = pnand %p370_p0, %p364_p5 }
  0x1f   : > { %374 = shalt.err (!%p371_p1)
}
  0x20   : > { %s375_s11 = scalar_lea.vmem %s536_s27, 192  ;;  %s458_s13 = smov [#allocation2]  }
  0x21   : > { %p376_p2 = scmp.ne.s32.totalorder %s536_s27, %s375_s11  ;;  %s380_s14 = sshll.u32 %s458_s13, 4  ;;  %s381_s14 = int_to_ptr.vmem [resolvable:$false] %s380_s14 }
  0x22   : > { %s382_s19 = scalar_lea.vmem %s381_s14, 384  ;;  %p383_p11 = scmp.lt.s32.totalorder %s536_s27, %s381_s14 }
  0x23   : > { %p378_p4 = pnand %p376_p2, %p362_p3  ;;  %p384_p7 = scmp.lt.s32.totalorder %s382_s19, %s375_s11 }
  0x25   : > { %p379_p12 = pneg %p378_p4  ;;  %p385_p8 = por %p384_p7, %p383_p11 }
  0x27   : > { %p386_p9 = pnand %p385_p8, %p379_p12 }
  0x29   : > { %389 = shalt.err (!%p386_p9)
}
  0x2a   : > { %321 = dma.hbm_to_vmem [thread:$0]  (!%p531_p13), %s529_s24, 192, %s536_s27, %s88_s28  }
  0x2b   : > { %p633_p0 = scmp.lt.s32.totalorder %s456_s9, 3  ;;  %p634_p1 = scmp.ge.s32.totalorder %s456_s9, 1 }
  0x2d   : > { %p105_p3 = pnand %p634_p1, %p633_p0 }
  0x2e   : > { %s569_s20 = sand.u32 (!%p105_p3), 1, %s448_s7  }
  0x2f   : > { %108 = sbr.rel (%p105_p3) target bundleno = 245 (0xf5), region = 24  ;;  %s111_s22 = scalar_lea.sflag (!%p105_p3), [#allocation3], %s569_s20 }
  0x30   : > { %s311_s21 = smul.u32 (!%p105_p3), 12, %s569_s20 }
  0x32   : > { %s114_s23 = scalar_lea.vmem (!%p105_p3), [#allocation2], %s311_s21 }
  0x36   : > { %435 = dma.done.wait (%p509_p6), %s111_s22, 192  }
  0x37   : > { %437 = vsyncadd (%p509_p6), %s111_s22, 4294967104  ;;  %v133_v0 = vld [vmem:[%s114_s23] sm:$0xff]  ;;  %v134_v1 = vld [vmem:[%s114_s23 + $0x8] sm:$0xf]  ;;  %s312_s16 = smul.u32 48, %s569_s20  ;;  %s217_s29 = scalar_lea.sflag [#allocation4], %s569_s20 }
  0x38   : > { %v135_v2 = vunpack.c.0.s8 %v133_v0  ;;  %v136_v3 = vunpack.c.1.s8 %v133_v0  ;;  %v137_v4 = vunpack.c.2.s8 %v133_v0  ;;  %v138_v5 = vunpack.c.3.s8 %v133_v0  ;;  %s313_s24 = smul.u32 768, %s491_s10  ;;  %p635_p11 = scmp.ne.s32.totalorder %s630_s17, 0 }
  0x39   : > { %v139_v6 = vunpack.c.0.s8 %v134_v1  ;;  %v140_v7 = vunpack.c.1.s8 %v134_v1  ;;  %s132_s25 = scalar_lea.vmem [#allocation5], %s312_s16  ;;  %s459_s2 = smov [#allocation5]  }
  0x3a   : > { %v141_v8 = vand.u32 255, %v135_v2  ;;  %v142_v9 = vand.u32 255, %v136_v3  ;;  %v143_v10 = vand.u32 255, %v137_v4  ;;  %v144_v11 = vand.u32 255, %v138_v5  ;;  %s231_s26 = sshll.u32 %s132_s25, 4  ;;  %s582_s28 = scalar_lea.hbm %s627_s1, %s313_s24  ;;  %s584_s26 = int_to_ptr.vmem [resolvable:$true] %s231_s26 }
  0x3b   : > { %v145_v12 = vand.u32 255, %v139_v6  ;;  %v146_v13 = vand.u32 255, %v140_v7  ;;  %s390_s30 = scalar_lea.vmem %s584_s26, 768  ;;  %s394_s3 = sshll.u32 %s459_s2, 4  ;;  %s395_s3 = int_to_ptr.vmem [resolvable:$false] %s394_s3 }
  0x3c   : > { %v147_v14 = vcvt.s32.f32 %v141_v8  ;;  %v148_v15 = vcvt.s32.f32 %v142_v9  ;;  %v149_v16 = vcvt.s32.f32 %v143_v10  ;;  %v150_v17 = vcvt.s32.f32 %v144_v11  ;;  %p391_p6 = scmp.ne.s32.totalorder %s584_s26, %s390_s30  ;;  %s396_s4 = scalar_lea.vmem %s395_s3, 1536 }
  0x3d   : > { %v151_v18 = vcvt.s32.f32 %v145_v12  ;;  %v152_v19 = vcvt.s32.f32 %v146_v13  ;;  %p397_p5 = scmp.lt.s32.totalorder %s584_s26, %s395_s3  ;;  %p398_p10 = scmp.lt.s32.totalorder %s396_s4, %s390_s30 }
  0x3e   : > { %v153_v20 = vmul.f32 1.27, %v147_v14  ;;  %v154_v21 = vmul.f32 1.27, %v148_v15  ;;  %v155_v22 = vmul.f32 1.27, %v149_v16  ;;  %p392_p12 = pnand %p391_p6, %p635_p11 }
  0x3f   : > { %v156_v23 = vmul.f32 1.27, %v150_v17  ;;  %v157_v24 = vmul.f32 1.27, %v151_v18  ;;  %v158_v25 = vmul.f32 1.27, %v152_v19  ;;  %p399_p2 = por %p398_p10, %p397_p5 }
  0x40   : > { %v159_v26 = vmin.f32 %v153_v20, 255.0  ;;  %v160_v27 = vmin.f32 %v154_v21, 255.0  ;;  %v161_v28 = vmin.f32 %v155_v22, 255.0  ;;  %p393_p13 = pneg %p392_p12 }
  0x41   : > { %v162_v29 = vmin.f32 %v156_v23, 255.0  ;;  %v163_v30 = vmin.f32 %v157_v24, 255.0  ;;  %v164_v31 = vmin.f32 %v158_v25, 255.0 }
  0x42   : > { %v165_v32 = vmul.f32 0.2989, %v159_v26  ;;  %v166_v33 = vmul.f32 0.2989, %v160_v27  ;;  %v167_v34 = vmul.f32 0.587, %v161_v28  ;;  %p400_p4 = pnand %p399_p2, %p393_p13 }
  0x43   : > { %v168_v35 = vmul.f32 0.587, %v162_v29  ;;  %v171_v36 = vmul.f32 0.114, %v163_v30  ;;  %v172_v37 = vmul.f32 0.114, %v164_v31 }
  0x44   : > { %v169_v38 = vadd.f32 %v167_v34, %v165_v32  ;;  %v182_v45 = vmul.f32 0.02016353, %v159_v26  ;;  %v183_v46 = vmul.f32 0.02016353, %v160_v27  ;;  %v194_v47 = vmul.f32 0.020453356, %v161_v28 }
  0x45   : > { %v170_v39 = vadd.f32 %v168_v35, %v166_v33  ;;  %v195_v48 = vmul.f32 0.020453356, %v162_v29  ;;  %v206_v52 = vmul.f32 0.019038197, %v163_v30  ;;  %v207_v53 = vmul.f32 0.019038197, %v164_v31 }
  0x46   : > { %v173_v40 = vadd.f32 %v171_v36, %v169_v38 }
  0x47   : > { %v174_v41 = vadd.f32 %v172_v37, %v170_v39 }
  0x49   : > { %v175_v42 = vadd.f32 %v174_v41, %v173_v40 }
  0x4b   : > { %176 = vadd.xlane.f32.xlu0 %v175_v42 }
  0xd8   : > { %v177_v43 = vpop.xlane.xlu0 %176 }
  0xd9   : > { %v179_v44 = vmul.f32 0.00390625, %v177_v43 }
  0xdb   : > { %v180_v49 = vmul.f32 -0.004286735, %v179_v44  ;;  %v192_v50 = vmul.f32 -0.004348351, %v179_v44  ;;  %v204_v51 = vmul.f32 -0.0040474907, %v179_v44 }
  0xdd   : > { %v181_v54 = vadd.f32 -1.9894737, %v180_v49  ;;  %v193_v55 = vadd.f32 -1.9802874, %v192_v50  ;;  %v205_v56 = vadd.f32 -1.7068043, %v204_v51 }
  0xdf   : > { %v184_v57 = vadd.f32 %v182_v45, %v181_v54  ;;  %v185_v58 = vadd.f32 %v183_v46, %v181_v54  ;;  %v196_v59 = vadd.f32 %v194_v47, %v193_v55  ;;  %v197_v60 = vadd.f32 %v195_v48, %v193_v55 }
  0xe0   : > { %v208_v61 = vadd.f32 %v206_v52, %v205_v56  ;;  %v209_v62 = vadd.f32 %v207_v53, %v205_v56 }
  0xe1   : > { %v186_v63 = vmax.f32 %v184_v57, -1.9894737  ;;  %v187_v0 = vmax.f32 %v185_v58, -1.9894737  ;;  %v198_v1 = vmax.f32 %v196_v59, -1.9802874 }
  0xe2   : > { %v199_v2 = vmax.f32 %v197_v60, -1.9802874  ;;  %v210_v3 = vmax.f32 %v208_v61, -1.7068043  ;;  %v211_v4 = vmax.f32 %v209_v62, -1.7068043 }
  0xe3   : > { %v188_v5 = vmin.f32 %v186_v63, 2.0591092  ;;  %v189_v6 = vmin.f32 %v187_v0, 2.0591092  ;;  %v200_v7 = vmin.f32 %v198_v1, 2.1264887 }
  0xe4   : > { %v201_v8 = vmin.f32 %v199_v2, 2.1264887  ;;  %v212_v9 = vmin.f32 %v210_v3, 2.1158257  ;;  %v213_v10 = vmin.f32 %v211_v4, 2.1158257 }
  0xe5   : > { %190 = vst [vmem:[%s132_s25] sm:$0xff] %v188_v5  ;;  %191 = vst [vmem:[%s132_s25 + $0x8] sm:$0xff] %v189_v6 }
  0xe6   : > { %202 = vst [vmem:[%s132_s25 + $0x10] sm:$0xff] %v200_v7  ;;  %203 = vst [vmem:[%s132_s25 + $0x18] sm:$0xff] %v201_v8 }
  0xe7   : > { %214 = vst [vmem:[%s132_s25 + $0x20] sm:$0xff] %v212_v9  ;;  %215 = vst [vmem:[%s132_s25 + $0x28] sm:$0xff] %v213_v10 }
  0xe8   : > { %403 = shalt.err (!%p400_p4)
}
  0xe9   : > { %s404_s5 = scalar_lea.hbm %s582_s28, 768  ;;  %s408_s14 = scalar_lea.hbm %s627_s1, 1536 }
  0xea   : > { %p405_p7 = scmp.ne.s32.totalorder %s582_s28, %s404_s5  ;;  %p409_p0 = scmp.lt.u32.totalorder %s582_s28, %s627_s1 }
  0xeb   : > { %p410_p1 = scmp.lt.u32.totalorder %s408_s14, %s404_s5  ;;  %p412_p6 = scmp.lt.u32.totalorder %s404_s5, %s582_s28 }
  0xec   : > { %p406_p8 = pnand %p405_p7, %p635_p11 }
  0xed   : > { %p411_p3 = por %p410_p1, %p409_p0 }
  0xee   : > { %p407_p9 = pneg %p406_p8 }
  0xef   : > { %p413_p12 = por %p412_p6, %p411_p3 }
  0xf1   : > { %p414_p13 = pnand %p413_p12, %p407_p9 }
  0xf3   : > { %417 = shalt.err (!%p414_p13)
}
  0xf4   : > { %316 = dma.vmem_to_hbm [thread:$0]  (%p635_p11), %s584_s26, 768, %s582_s28, %s217_s29  }
  0xf5 PF: > { %s243_s21 = sand.u32 1, %s444_s6   ;;  %p636_p5 = scmp.ne.s32.totalorder %s631_s18, 0 }
  0xf6   : > { %p637_p10 = scmp.ge.s32.totalorder %s456_s9, 2  ;;  %s244_s22 = scalar_lea.sflag [#allocation4], %s243_s21 }
  0xf8   : > { %p323_p2 = pnand %p637_p10, %p636_p5 }
  0xfa   : > { %439 = dma.done.wait (!%p323_p2), %s244_s22, 768  }
  0xfb   : > { %441 = vsyncadd (!%p323_p2), %s244_s22, 4294966528  ;;  %p14_p4 = scmp.ge.s32.totalorder %s495_s12, 4   ;;  %s638_s6 = smov %s448_s7 }
  0xfc   : > { %s639_s7 = smov %s452_s8  ;;  %s640_s8 = smov %s507_s15 }
  0xfd   : > { %s641_s9 = smov %s495_s12  ;;  %16 = sbr.rel (!%p14_p4) target bundleno = 5 (0x5), region = 69 }
 0x104   :  { %249 = vsyncpa [#allocation3], 1 }
 0x105   :  { %251 = vsyncpa [#allocation3 + $0x1], 1 }
 0x106   :  { %252 = vsyncpa [#allocation4], 1 }
 0x107   :  { %254 = vsyncpa [#allocation4 + $0x1], 1 }

</bundles_post_ra>
